<compile_context>
chip_gen: v7x
topology: tpu7x:2x2x1
jax: 0.10.0
libtpu: 0.0.40
codegen_flags: <defaults>
</compile_context>

<pallas_src>
import functools

import jax
import jax.numpy as jnp
from jax.experimental import pallas as pl
from jax.experimental.pallas import tpu as pltpu


def _swiglu_kernel(x_ref, w12_ref, b12_ref, w3_ref, b3_ref, o_ref, acc_ref):
    h = pl.program_id(1)

    @pl.when(h == 0)
    def _init():
        acc_ref[...] = jnp.zeros_like(acc_ref)

    x = x_ref[...]                                               # (tm, D) bf16
    # Single fused matmul for both branches; f32 accumulation on the MXU.
    y = jnp.dot(x, w12_ref[...], preferred_element_type=jnp.float32) + b12_ref[...]
    th = y.shape[-1] // 2
    x1 = y[:, :th]                                               # gate branch
    x2 = y[:, th:]                                               # value branch
    # SiLU = x / (1 + exp(-x)); reciprocal goes to the EUP slot (free-ish).
    gate = x1 * pl.reciprocal(1.0 + jnp.exp(-x1), approx=True)
    hidden = gate * x2                                           # (tm, tH) f32
    # ffn_ln is nn.Identity() (subln=False); drop=0.0 -> both are no-ops.
    acc_ref[...] += jnp.dot(hidden.astype(w3_ref.dtype), w3_ref[...],
                            preferred_element_type=jnp.float32)

    @pl.when(h == pl.num_programs(1) - 1)
    def _finalize():
        # b3 added exactly once, after the full hidden-dim reduction.
        o_ref[...] = (acc_ref[...] + b3_ref[...]).astype(o_ref.dtype)


def _pick_hidden_tile(H, max_th):
    """Largest tile dividing H with lane-dense blocks (2*tH % 128 == 0),
    not exceeding max_th. Falls back to the full H if no such divisor exists
    (guard: better a clear VMEM error than an illegal / masked layout)."""
    max_th = int(min(max_th, H))
    if max_th >= H:
        return H
    for align in (128, 64):          # 64 still keeps 2*tH a multiple of 128
        t = (max_th // align) * align
        while t >= align:
            if H % t == 0:
                return t
            t -= align
    return H


@functools.partial(jax.jit, static_argnames=("tm", "th", "compute_dtype"))
def swiglu_pallas(x, w1, b1, w2, b2, w3, b3, *, tm=1024, th=None,
                  compute_dtype=jnp.bfloat16):
    """x: (B, N, D). Weights stored (in, out); biases (1, out)."""
    B, N, D = x.shape
    H = w1.shape[1]
    O = w3.shape[1]
    M = B * N
    assert tm % 8 == 0, "token tile must be sublane-aligned"

    cd = jnp.dtype(compute_dtype)
    out_dt = x.dtype

    # ---- per-generation VMEM budget (v5e/v6e: 128 MiB, v7x: 64 MiB/TC) ----
    try:
        vmem_cap = int(pltpu.get_tpu_info().vmem_capacity_bytes)
    except Exception:
        vmem_cap = 64 * 1024 * 1024                 # conservative fallback
    vmem_limit = int(vmem_cap * 0.85)               # headroom for Mosaic scratch
    budget = int(vmem_limit * 0.90)                 # planning budget for buffers

    # ---- tile selection ----------------------------------------------------
    tm_eff = tm if M >= tm else M                   # ragged last tile is masked
    th_max = H if th is None else min(int(th), H)

    def _weight_bytes(t, nbuf):                     # W12 + W3 slices of width t
        return nbuf * t * (2 * D + O) * cd.itemsize

    def _interm_bytes(t):                           # f32 matmul outputs + temps
        return 16 * tm_eff * t

    fixed = (2 * tm_eff * D * cd.itemsize                       # x tile (2 bufs)
             + 2 * tm_eff * O * jnp.dtype(out_dt).itemsize      # out tile (2 bufs)
             + tm_eff * O * 4                                   # f32 accumulator
             + 4 * (2 * H + O) * 2)                             # f32 biases

    if th_max >= H and fixed + _weight_bytes(H, 2) + _interm_bytes(H) <= budget:
        tH, w_nbuf = H, 2           # weights fully VMEM-resident (DMA'd once)
    elif th_max >= H and fixed + _weight_bytes(H, 1) + _interm_bytes(H) <= budget:
        tH, w_nbuf = H, 1           # resident, single-buffered weight specs
    else:
        per_th = _weight_bytes(1, 2) + _interm_bytes(1)
        th_cap = max((budget - fixed) // max(per_th, 1), 128)
        tH = _pick_hidden_tile(H, min(th_cap, th_max))
        w_nbuf = 2 if tH < H else 1  # guard: divisor fallback -> shave VMEM
    nH = H // tH

    # ---- operand packing (bf16 MXU operands, f32 biases) -------------------
    x2d = x.reshape(M, D).astype(compute_dtype)
    w1c = w1.astype(compute_dtype)
    w2c = w2.astype(compute_dtype)
    w3c = w3.astype(compute_dtype)
    b1f = b1.astype(jnp.float32)
    b2f = b2.astype(jnp.float32)
    b3f = b3.astype(jnp.float32)

    # Group W1/W2 (and b1/b2) per hidden tile so each grid step streams a
    # single contiguous (D, 2*tH) block: [gate tile h | value tile h].
    w12 = jnp.stack([w1c.reshape(D, nH, tH), w2c.reshape(D, nH, tH)],
                    axis=2).reshape(D, 2 * H)
    b12 = jnp.stack([b1f.reshape(1, nH, tH), b2f.reshape(1, nH, tH)],
                    axis=2).reshape(1, 2 * H)

    # Single-buffer the weight streams when they are grid-invariant/resident.
    w_spec_kwargs = {} if w_nbuf == 2 else dict(pipeline_mode=pl.Buffered(1))

    out2d = pl.pallas_call(
        _swiglu_kernel,
        out_shape=jax.ShapeDtypeStruct((M, O), out_dt),
        grid_spec=pltpu.PrefetchScalarGridSpec(
            num_scalar_prefetch=0,
            grid=(pl.cdiv(M, tm_eff), nH),               # reduction (H) axis last
            in_specs=[
                pl.BlockSpec((tm_eff, D), lambda i, h: (i, 0)),       # x tile
                pl.BlockSpec((D, 2 * tH), lambda i, h: (0, h),        # W1||W2
                             **w_spec_kwargs),
                pl.BlockSpec((1, 2 * tH), lambda i, h: (0, h)),       # b1||b2
                pl.BlockSpec((tH, O), lambda i, h: (h, 0),            # W3
                             **w_spec_kwargs),
                pl.BlockSpec((1, O), lambda i, h: (0, 0)),            # b3
            ],
            out_specs=pl.BlockSpec((tm_eff, O), lambda i, h: (i, 0)),
            scratch_shapes=[pltpu.VMEM((tm_eff, O), jnp.float32)],
        ),
        compiler_params=pltpu.CompilerParams(
            dimension_semantics=("parallel", "arbitrary"),
            vmem_limit_bytes=vmem_limit,
        ),
    )(x2d, w12, b12, w3c, b3f)

    return out2d.reshape(B, N, O)


def swiglu_ref(x, w1, b1, w2, b2, w3, b3):
    x1 = x @ w1 + b1[0]
    x2 = x @ w2 + b2[0]
    hidden = (x1 * jax.nn.sigmoid(x1)) * x2
    return hidden @ w3 + b3[0]


if __name__ == "__main__":
    # Small shapes consistent with the module (nn.Linear in->hidden->out).
    # Production eva_vit shapes (D~1408, H~6144) are lane-dense; these toy
    # dims are for a quick correctness check only.
    B, N = 2, 8                       # batch, sequence
    D_IN, D_HID, D_OUT = 32, 64, 32   # in_features, hidden_features, out_features

    key = jax.random.PRNGKey(0)
    kx, k1, k2, k3, kb1, kb2, kb3 = jax.random.split(key, 7)

    x = jax.random.normal(kx, (B, N, D_IN), dtype=jnp.float32)
    # Deterministic synthetic parameters (nn.Linear shapes, stored transposed).
    w1 = jax.random.normal(k1, (D_IN, D_HID), dtype=jnp.float32) * 0.05
    w2 = jax.random.normal(k2, (D_IN, D_HID), dtype=jnp.float32) * 0.05
    w3 = jax.random.normal(k3, (D_HID, D_OUT), dtype=jnp.float32) * 0.05
    b1 = jax.random.normal(kb1, (1, D_HID), dtype=jnp.float32) * 0.01
    b2 = jax.random.normal(kb2, (1, D_HID), dtype=jnp.float32) * 0.01
    b3 = jax.random.normal(kb3, (1, D_OUT), dtype=jnp.float32) * 0.01

    out = swiglu_pallas(x, w1, b1, w2, b2, w3, b3)
    out = jax.block_until_ready(out)

    ref = swiglu_ref(x, w1, b1, w2, b2, w3, b3)
    assert out.shape == (B, N, D_OUT)
    # bf16 matmul path + approx reciprocal -> looser tolerance than f32 ref.
    assert jnp.allclose(out, ref, atol=2e-2, rtol=2e-2), "mismatch vs reference"
    print("KERNEL_OK")
</pallas_src>

<mosaic_0001>
module attributes {stable_mosaic.version = 11 : i64} {
  func.func @_swiglu_kernel(%arg0: i32, %arg1: i32, %arg2: memref<16x32xbf16, #tpu.memory_space<vmem>>, %arg3: memref<32x128xbf16, #tpu.memory_space<vmem>>, %arg4: memref<1x128xf32, #tpu.memory_space<vmem>>, %arg5: memref<64x32xbf16, #tpu.memory_space<vmem>>, %arg6: memref<1x32xf32, #tpu.memory_space<vmem>>, %arg7: memref<16x32xf32, #tpu.memory_space<vmem>>, %arg8: memref<16x32xf32, #tpu.memory_space<vmem>>) attributes {dimension_semantics = [#tpu.dimension_semantics<parallel>, #tpu.dimension_semantics<arbitrary>], iteration_bounds = array<i64: 1, 1>, scalar_prefetch = 0 : i64, scratch_operands = 1 : i64, tpu.core_type = #tpu.core_type<tc>, window_params = [{transform_indices = @transform_0, window_bounds = array<i64: 16, 32>}, {transform_indices = @transform_1, window_bounds = array<i64: 32, 128>}, {transform_indices = @transform_2, window_bounds = array<i64: 1, 128>}, {transform_indices = @transform_3, window_bounds = array<i64: 64, 32>}, {pipeline_mode = #tpu.pipeline_mode<synchronous>, transform_indices = @transform_4, window_bounds = array<i64: 1, 32>}, {transform_indices = @transform_5, window_bounds = array<i64: 16, 32>}]} {
    %c0_i32 = arith.constant 0 : i32
    %0 = arith.cmpi eq, %arg1, %c0_i32 : i32
    %1 = arith.extui %0 : i1 to i32
    %c0_i32_0 = arith.constant 0 : i32
    %2 = arith.cmpi ne, %1, %c0_i32_0 : i32
    scf.if %2 {
      %cst_17 = arith.constant 0.000000e+00 : f32
      %28 = vector.broadcast %cst_17 : f32 to vector<16x32xf32>
      %c0_18 = arith.constant 0 : index
      %c0_19 = arith.constant 0 : index
      %29 = vector.load %arg8[%c0_18, %c0_19] : memref<16x32xf32, #tpu.memory_space<vmem>>, vector<16x32xf32>
      tpu.vector_store %arg8[%c0_18, %c0_19], %28 {strides = array<i32>} : memref<16x32xf32, #tpu.memory_space<vmem>>, vector<16x32xf32>,
    } else {
    }
    %c0 = arith.constant 0 : index
    %c0_1 = arith.constant 0 : index
    %3 = vector.load %arg2[%c0, %c0_1] : memref<16x32xbf16, #tpu.memory_space<vmem>>, vector<16x32xbf16>
    %c0_2 = arith.constant 0 : index
    %c0_3 = arith.constant 0 : index
    %4 = vector.load %arg3[%c0_2, %c0_3] : memref<32x128xbf16, #tpu.memory_space<vmem>>, vector<32x128xbf16>
    %cst = arith.constant dense<0.000000e+00> : vector<16x128xf32>
    %5 = tpu.matmul %3, %4, %cst {dimension_numbers = #tpu.dot_dimension_numbers<[1], [0], [0], [1], [0, 0, 1, 1], [], []>} : vector<16x32xbf16>, vector<32x128xbf16>, vector<16x128xf32> -> vector<16x128xf32>
    %c0_4 = arith.constant 0 : index
    %c0_5 = arith.constant 0 : index
    %6 = vector.load %arg4[%c0_4, %c0_5] : memref<1x128xf32, #tpu.memory_space<vmem>>, vector<1x128xf32>
    %7 = vector.broadcast %6 : vector<1x128xf32> to vector<16x128xf32>
    %8 = arith.addf %5, %7 : vector<16x128xf32>
    %9 = vector.extract_strided_slice %8 {offsets = [0, 0], sizes = [16, 64], strides = [1, 1]} : vector<16x128xf32> to vector<16x64xf32>
    %10 = vector.extract_strided_slice %8 {offsets = [0, 64], sizes = [16, 64], strides = [1, 1]} : vector<16x128xf32> to vector<16x64xf32>
    %cst_6 = arith.constant 0.000000e+00 : f32
    %11 = vector.broadcast %cst_6 : f32 to vector<16x64xf32>
    %12 = arith.subf %11, %9 : vector<16x64xf32>
    %13 = math.exp %12 : vector<16x64xf32>
    %cst_7 = arith.constant 1.000000e+00 : f32
    %14 = vector.broadcast %cst_7 : f32 to vector<16x64xf32>
    %15 = arith.addf %14, %13 : vector<16x64xf32>
    %16 = tpu.reciprocal %15 {approx = true} : vector<16x64xf32> -> vector<16x64xf32>
    %17 = arith.mulf %9, %16 : vector<16x64xf32>
    %18 = arith.mulf %17, %10 : vector<16x64xf32>
    %c0_8 = arith.constant 0 : index
    %c0_9 = arith.constant 0 : index
    %19 = vector.load %arg8[%c0_8, %c0_9] : memref<16x32xf32, #tpu.memory_space<vmem>>, vector<16x32xf32>
    %20 = arith.truncf %18 : vector<16x64xf32> to vector<16x64xbf16>
    %c0_10 = arith.constant 0 : index
    %c0_11 = arith.constant 0 : index
    %21 = vector.load %arg5[%c0_10, %c0_11] : memref<64x32xbf16, #tpu.memory_space<vmem>>, vector<64x32xbf16>
    %cst_12 = arith.constant dense<0.000000e+00> : vector<16x32xf32>
    %22 = tpu.matmul %20, %21, %cst_12 {dimension_numbers = #tpu.dot_dimension_numbers<[1], [0], [0], [1], [0, 0, 1, 1], [], []>} : vector<16x64xbf16>, vector<64x32xbf16>, vector<16x32xf32> -> vector<16x32xf32>
    %23 = arith.addf %19, %22 : vector<16x32xf32>
    %c0_13 = arith.constant 0 : index
    %c0_14 = arith.constant 0 : index
    %24 = vector.load %arg8[%c0_13, %c0_14] : memref<16x32xf32, #tpu.memory_space<vmem>>, vector<16x32xf32>
    tpu.vector_store %arg8[%c0_13, %c0_14], %23 {strides = array<i32>} : memref<16x32xf32, #tpu.memory_space<vmem>>, vector<16x32xf32>,
    %c0_i32_15 = arith.constant 0 : i32
    %25 = arith.cmpi eq, %arg1, %c0_i32_15 : i32
    %26 = arith.extui %25 : i1 to i32
    %c0_i32_16 = arith.constant 0 : i32
    %27 = arith.cmpi ne, %26, %c0_i32_16 : i32
    scf.if %27 {
      %c0_17 = arith.constant 0 : index
      %c0_18 = arith.constant 0 : index
      %28 = vector.load %arg8[%c0_17, %c0_18] : memref<16x32xf32, #tpu.memory_space<vmem>>, vector<16x32xf32>
      %c0_19 = arith.constant 0 : index
      %c0_20 = arith.constant 0 : index
      %29 = vector.load %arg6[%c0_19, %c0_20] : memref<1x32xf32, #tpu.memory_space<vmem>>, vector<1x32xf32>
      %30 = vector.broadcast %29 : vector<1x32xf32> to vector<16x32xf32>
      %31 = arith.addf %28, %30 : vector<16x32xf32>
      %c0_21 = arith.constant 0 : index
      %c0_22 = arith.constant 0 : index
      %32 = vector.load %arg7[%c0_21, %c0_22] : memref<16x32xf32, #tpu.memory_space<vmem>>, vector<16x32xf32>
      tpu.vector_store %arg7[%c0_21, %c0_22], %31 {strides = array<i32>} : memref<16x32xf32, #tpu.memory_space<vmem>>, vector<16x32xf32>,
    } else {
    }
    return
  }
  func.func @transform_0(%arg0: i32, %arg1: i32) -> (i32, i32) {
    %c0_i32 = arith.constant 0 : i32
    %c0_i32_0 = arith.constant 0 : i32
    return %arg0, %c0_i32 : i32, i32
  }
  func.func @transform_1(%arg0: i32, %arg1: i32) -> (i32, i32) {
    %c0_i32 = arith.constant 0 : i32
    %c0_i32_0 = arith.constant 0 : i32
    return %c0_i32, %arg1 : i32, i32
  }
  func.func @transform_2(%arg0: i32, %arg1: i32) -> (i32, i32) {
    %c0_i32 = arith.constant 0 : i32
    %c0_i32_0 = arith.constant 0 : i32
    return %c0_i32, %arg1 : i32, i32
  }
  func.func @transform_3(%arg0: i32, %arg1: i32) -> (i32, i32) {
    %c0_i32 = arith.constant 0 : i32
    %c0_i32_0 = arith.constant 0 : i32
    return %arg1, %c0_i32 : i32, i32
  }
  func.func @transform_4(%arg0: i32, %arg1: i32) -> (i32, i32) {
    %c0_i32 = arith.constant 0 : i32
    %c0_i32_0 = arith.constant 0 : i32
    %c0_i32_1 = arith.constant 0 : i32
    return %c0_i32, %c0_i32_0 : i32, i32
  }
  func.func @transform_5(%arg0: i32, %arg1: i32) -> (i32, i32) {
    %c0_i32 = arith.constant 0 : i32
    %c0_i32_0 = arith.constant 0 : i32
    return %arg0, %c0_i32 : i32, i32
  }
}

</mosaic_0001>

<bundles_post_ra>
// kernel: swiglu_pallas.1
= control target key start
LH: loop header
LB: loop body
LE: loop exit
PB: predicated region body
PF: predicated region fallthrough
CT: control target
= control target key end

     0   :  { %v326_v1 = vmov 0.0   ;;  %vm327_vm0 = vmmov 0   ;;  %vm26_vm1 = vcmask 261120   ;;  %s408_s0 = inlined_call_operand.vmem [shape: bf16[16,32], index: 0, kind: input, shape index: {}]   ;;  %s409_s1 = inlined_call_operand.vmem [shape: bf16[32,128], index: 1, kind: input, shape index: {}]   ;;  %s410_s2 = inlined_call_operand.vmem [shape: f32[1,128], index: 2, kind: input, shape index: {}]   ;;  %s411_s3 = inlined_call_operand.vmem [shape: bf16[64,32], index: 3, kind: input, shape index: {}]   ;;  %s412_s4 = inlined_call_operand.vmem [shape: f32[1,32], index: 4, kind: input, shape index: {}]   ;;  %s413_s5 = inlined_call_operand.hbm [shape: f32[16,32], index: 5, kind: output, shape index: {}]  }
   0x1   :  { %v287_v0 = vld [vmem:[%s409_s1] sm:$0xff]   ;;  %261 = vmatprep.subr.bf16.mxu0 %v326_v1  ;;  %269 = vmatprep.subr.bf16.mxu1 %v326_v1  ;;  %v288_v2 = vld [vmem:[%s409_s1 + $0x8] sm:$0xff]   ;;  %27 = vst.msk [vmem:[#allocation2] sm:$0xff] %vm26_vm1, %v326_v1  ;;  %28 = vst.msk [vmem:[#allocation2 + $0x8] sm:$0xff] %vm26_vm1, %v326_v1 }
   0x2   :  { %262 = vmatpush3.bf16.msra.mxu0 %v287_v0  ;;  %265 = vmatprep.mubr.msk.bf16.mxu0 %vm327_vm0, %v326_v1  ;;  %v289_v3 = vld [vmem:[%s408_s0] sm:$0xff]  }
   0x3   :  { %263 = vmatprep.subr.bf16.mxu0 %v326_v1  ;;  %277 = vmatprep.mubr.msk.bf16.mxu1 %vm327_vm0, %v326_v1 }
   0x6   :  { %264 = vmatpush3.bf16.msra.mxu0 %v288_v2 }
   0x7   :  { %10 = vsyncpa [#allocation4], 0  ;;  %v290_v4 = vld [vmem:[%s411_s3] sm:$0xff]   ;;  %v291_v5 = vld [vmem:[%s411_s3 + $0x8] sm:$0xff]   ;;  %s328_s7 = smov 64   ;;  %vm161_vm2 = vcmask 523264  }
   0x8   :  { %270 = vmatpush3.bf16.msra.mxu1 %v290_v4  ;;  %v292_v6 = vld [vmem:[%s411_s3 + $0x10] sm:$0xff]   ;;  %v293_v7 = vld [vmem:[%s411_s3 + $0x18] sm:$0xff]   ;;  %v242_v8 = vld [vmem:[%s410_s2] ss:$0 sm:$0xff]  ;;  %s329_s8 = smov [#allocation3]  }
   0x9   :  { %266 = vmatmul.mubr.msk.bf16.vlgmr.msra.gmra.mrb[0].mxu0 %vm26_vm1, %v289_v3  ;;  %271 = vmatprep.subr.bf16.mxu1 %v326_v1  ;;  %v126_v32 = vld [vmem:[#allocation2] sm:$0xff]  ;;  %v127_v34 = vld [vmem:[#allocation2 + $0x8] sm:$0xff]  ;;  %s231_s9 = sshll.u32 %s329_s8, 4  ;;  %s232_s9 = int_to_ptr.vmem [resolvable:$true] %s231_s9 }
   0xa   :  { %v252_v40 = vld [vmem:[%s412_s4] ss:$0 sm:$0xff]  ;;  %s302_s10 = scalar_lea.vmem %s232_s9, 256  ;;  %p307_p1 = scmp.lt.s32.totalorder %s232_s9, %s232_s9 }
   0xb   :  { %p303_p0 = scmp.ne.s32.totalorder %s232_s9, %s302_s10  ;;  %p308_p2 = scmp.lt.s32.totalorder %s302_s10, %s302_s10 }
   0xc   :  { %272 = vmatpush3.bf16.msra.mxu1 %v291_v5 }
   0xd   :  { %273 = vmatprep.subr.bf16.mxu1 %v326_v1  ;;  %p309_p3 = por %p308_p2, %p307_p1 }
   0xf   :  { %p310_p4 = pnand %p309_p3, %p303_p0 }
  0x10   :  { %274 = vmatpush3.bf16.msra.mxu1 %v292_v6 }
  0x11   :  { %275 = vmatprep.subr.bf16.mxu1 %v326_v1 }
  0x14   :  { %276 = vmatpush3.bf16.msra.mxu1 %v293_v7 }
  0xdc   :  { %v97_v9 = vpop.f32.mrb[0].mxu0 }
  0xdd   :  { %v98_v10 = vadd.f32 %v242_v8, %v97_v9  ;;  %v267_v11 = vpop.f32.mrb[1].mxu0 }
  0xde   :  { %v100_v12 = vpop.f32.mrb[2].mxu0 }
  0xdf   :  { %118 = vrot.lane.b32.xlu0 %v98_v10, %s328_s7  ;;  %v268_v13 = vpop.f32.mrb[3].mxu0  ;;  %v101_v14 = vadd.f32 %v242_v8, %v100_v12  ;;  %v104_v15 = vsub.f32 0.0, %v98_v10 }
  0xe1   :  { %v105_v16 = vsub.f32 0.0, %v101_v14  ;;  %v106_v17 = vmul.f32 1.442695, %v104_v15 }
  0xe3   :  { %120 = vrot.lane.b32.xlu0 %v101_v14, %s328_s7  ;;  %v108_v18 = vmul.f32 1.442695, %v105_v16  ;;  %294 = vpow2.f32 %v106_v17 }
  0xe5   :  { %296 = vpow2.f32 %v108_v18 }
  0xed   :  { %v295_v19 = vpop.eup %294 }
  0xee   :  { %v110_v21 = vadd.f32 1.0, %v295_v19 }
  0xef   :  { %v297_v20 = vpop.eup %296 }
  0xf0   :  { %v111_v22 = vadd.f32 1.0, %v297_v20  ;;  %298 = vrcp.f32 %v110_v21 }
  0xf2   :  { %300 = vrcp.f32 %v111_v22 }
  0xfa   :  { %v299_v23 = vpop.eup %298 }
  0xfb   :  { %v114_v26 = vmul.f32 %v299_v23, %v98_v10 }
  0xfc   :  { %v301_v24 = vpop.eup %300 }
  0xfd   :  { %v115_v27 = vmul.f32 %v301_v24, %v101_v14 }
 0x151   :  { %v119_v25 = vpop.permute.xlu0 %118 }
 0x152   :  { %v124_v29 = vmul.f32 %v119_v25, %v114_v26 }
 0x155   :  { %v121_v28 = vpop.permute.xlu0 %120 }
 0x156   :  { %v125_v30 = vmul.f32 %v121_v28, %v115_v27 }
 0x158   :  { %v128_v31 = vpack.c.bf16 %v125_v30, %v124_v29 }
 0x15a   :  { %278 = vmatmul.mubr.msk.bf16.vlgmr.msra.gmra.mrb[0].mxu1 %vm161_vm2, %v128_v31 }
 0x22d   :  { %v199_v33 = vpop.f32.mrb[0].mxu1 }
 0x22e   :  { %v206_v35 = vadd.f32 %v199_v33, %v126_v32  ;;  %v279_v36 = vpop.f32.mrb[1].mxu1 }
 0x22f   :  { %v202_v37 = vpop.f32.mrb[2].mxu1 }
 0x230   :  { %208 = vst.msk [vmem:[#allocation2] sm:$0xff] %vm26_vm1, %v206_v35  ;;  %v207_v38 = vadd.f32 %v202_v37, %v127_v34  ;;  %v280_v39 = vpop.f32.mrb[3].mxu1 }
 0x232   :  { %209 = vst.msk [vmem:[#allocation2 + $0x8] sm:$0xff] %vm26_vm1, %v207_v38 }
 0x237   :  { %v213_v41 = vld [vmem:[#allocation2] sm:$0xff] }
 0x238   :  { %v222_v42 = vadd.f32 %v252_v40, %v213_v41 }
 0x239   :  { %v214_v43 = vld [vmem:[#allocation2 + $0x8] sm:$0xff] }
 0x23a   :  { %v223_v44 = vadd.f32 %v252_v40, %v214_v43  ;;  %224 = vst.msk [vmem:[#allocation3] sm:$0xff] %vm26_vm1, %v222_v42 }
 0x23c   :  { %225 = vst.msk [vmem:[#allocation3 + $0x8] sm:$0xff] %vm26_vm1, %v223_v44 }
 0x23d   :  { %313 = shalt.err (!%p310_p4)
}
 0x23e   :  { %s314_s12 = scalar_lea.hbm %s413_s5, 256 }
 0x23f   :  { %p315_p5 = scmp.ne.s32.totalorder %s413_s5, %s314_s12  ;;  %p318_p6 = scmp.lt.u32.totalorder %s314_s12, %s413_s5 }
 0x241   :  { %p320_p7 = pnand %p318_p6, %p315_p5 }
 0x243   :  { %323 = shalt.err (!%p320_p7)
}
 0x244   :  { %s330_s17 = smov 128   ;;  %s331_s18 = smov 8  }
 0x245   :  { %237 = dma.vmem_to_hbm [thread:$0]  %s232_s9, 256, %s413_s5, [#allocation4], %s330_s17, %s330_s17, %s331_s18  }
 0x246   :  { %324 = dma.done.wait [#allocation4], 256  }
 0x247   :  { %325 = vsyncadd [#allocation4], 4294967040 }
 0x248   :  { %241 = vsyncpa [#allocation4], 1 }

</bundles_post_ra>
